<compile_context>
chip_gen: v7x
topology: tpu7x:2x2x1
jax: 0.10.0
libtpu: 0.0.40
codegen_flags: <defaults>
</compile_context>

<pallas_src>
import functools

import jax
import jax.numpy as jnp
from jax.experimental import pallas as pl
from jax.experimental.pallas import tpu as pltpu

# --- Module hyperparameters (from the PyTorch spec) ---
K = 2
ACTION_FOR_FACILITIES = [0, 20, 50]
ACTION_FOR_FACTORY = [0, 20, 80]
NUM_ACTIONS = len(ACTION_FOR_FACTORY) * len(ACTION_FOR_FACILITIES) ** K  # 27
STATE_DIM = K * 3 + 1                                                     # 7
ACTION_DIM = NUM_ACTIONS                                                  # 27
HIDDEN_SIZE = 100

# --- Padded (tile-aligned) shapes ---
STATE_PAD = 8      # 7   -> 8   (contraction / x lane dim)
HIDDEN_PAD = 128   # 100 -> 128 (lane-dense hidden)
ACTION_PAD = 128   # 27  -> 128 (lane-dense output)
TB_MAX = 1024      # batch tile: amortizes grid-step overhead; VMEM use stays small


def _round_up(n, m):
    return ((n + m - 1) // m) * m


def dqn_kernel(x_ref, w1_ref, b1_ref, w2_ref, b2_ref, out_ref):
    # Hidden layer: x @ W1 on the MXU (bf16 in / f32 acc); bias + ReLU in f32 (VPU).
    h = jnp.dot(x_ref[...], w1_ref[...], preferred_element_type=jnp.float32)
    h = jnp.maximum(h + b1_ref[...], 0.0)
    # Output layer: h @ W2 (bf16 in / f32 acc) + bias; bf16 lane-dense store.
    q = jnp.dot(h.astype(w2_ref.dtype), w2_ref[...],
                preferred_element_type=jnp.float32)
    out_ref[...] = (q + b2_ref[...]).astype(out_ref.dtype)


def prepare_params(w1, b1, w2, b2):
    """One-time padding + bf16 casting of the weights (hoisted out of the call path).

    w1: (STATE_DIM, HIDDEN), b1: (HIDDEN,), w2: (HIDDEN, ACTION), b2: (ACTION,).
    Weights are stored (in_features, out_features) so the kernel computes x @ W.
    """
    w1_p = jnp.pad(w1.astype(jnp.bfloat16),
                   ((0, STATE_PAD - STATE_DIM), (0, HIDDEN_PAD - HIDDEN_SIZE)))
    b1_p = jnp.pad(b1.astype(jnp.float32).reshape(1, -1),
                   ((0, 0), (0, HIDDEN_PAD - HIDDEN_SIZE)))
    w2_p = jnp.pad(w2.astype(jnp.bfloat16),
                   ((0, HIDDEN_PAD - HIDDEN_SIZE), (0, ACTION_PAD - ACTION_DIM)))
    b2_p = jnp.pad(b2.astype(jnp.float32).reshape(1, -1),
                   ((0, 0), (0, ACTION_PAD - ACTION_DIM)))
    return (w1_p, b1_p, w2_p, b2_p)


@jax.jit
def _dqn_forward_padded(x_p, w1_p, b1_p, w2_p, b2_p):
    """x_p: (B_pad, STATE_PAD) bf16 with B_pad a power-of-two bucket (>=16)."""
    B_pad = x_p.shape[0]

    # Batch tile: large to amortize grid overhead, but keep >=2 grid steps when
    # possible so v7x's two TensorCores both get work ("parallel" batch axis).
    if B_pad >= 32:
        tb = min(TB_MAX, _round_up(pl.cdiv(B_pad, 2), 16))
    else:
        tb = B_pad
    grid = (B_pad // tb,)

    cost = pl.CostEstimate(
        flops=2 * B_pad * (STATE_PAD * HIDDEN_PAD + HIDDEN_PAD * ACTION_PAD),
        transcendentals=0,
        bytes_accessed=(x_p.size * 2 + w1_p.size * 2 + w2_p.size * 2
                        + b1_p.size * 4 + b2_p.size * 4
                        + B_pad * ACTION_PAD * 2),
    )

    out_pad = pl.pallas_call(
        dqn_kernel,
        out_shape=jax.ShapeDtypeStruct((B_pad, ACTION_PAD), jnp.bfloat16),
        grid_spec=pltpu.PrefetchScalarGridSpec(
            num_scalar_prefetch=0,
            grid=grid,
            in_specs=[
                pl.BlockSpec((tb, STATE_PAD), lambda i: (i, 0)),          # x tile
                pl.BlockSpec((STATE_PAD, HIDDEN_PAD), lambda i: (0, 0)),  # W1 (resident)
                pl.BlockSpec((1, HIDDEN_PAD), lambda i: (0, 0)),          # b1 (resident)
                pl.BlockSpec((HIDDEN_PAD, ACTION_PAD), lambda i: (0, 0)), # W2 (resident)
                pl.BlockSpec((1, ACTION_PAD), lambda i: (0, 0)),          # b2 (resident)
            ],
            out_specs=pl.BlockSpec((tb, ACTION_PAD), lambda i: (i, 0)),
        ),
        compiler_params=pltpu.CompilerParams(
            dimension_semantics=("parallel",),
        ),
        cost_estimate=cost,
    )(x_p, w1_p, b1_p, w2_p, b2_p)

    # Slice lanes + cast back to f32 inside the jit (fuses with the epilogue).
    return out_pad[:, :ACTION_DIM].astype(jnp.float32)


def dqn_forward(x, params):
    """x: (B, STATE_DIM) f32; params from prepare_params. Returns (B, ACTION_DIM) f32."""
    w1_p, b1_p, w2_p, b2_p = params
    B = x.shape[0]
    # Bucket the batch to a power of two (>=16) so varying B reuses compiles.
    B_pad = max(16, pl.next_power_of_2(B))
    x_p = jnp.pad(x.astype(jnp.bfloat16),
                  ((0, B_pad - B), (0, STATE_PAD - STATE_DIM)))
    q = _dqn_forward_padded(x_p, w1_p, b1_p, w2_p, b2_p)
    return q[:B]


def init_params(key):
    """Deterministic init mimicking PyTorch nn.Linear default U(-1/sqrt(fan_in), +)."""
    k1, k2, k3, k4 = jax.random.split(key, 4)
    bound1 = 1.0 / jnp.sqrt(STATE_DIM)
    bound2 = 1.0 / jnp.sqrt(HIDDEN_SIZE)
    w1 = jax.random.uniform(k1, (STATE_DIM, HIDDEN_SIZE), jnp.float32, -bound1, bound1)
    b1 = jax.random.uniform(k2, (HIDDEN_SIZE,), jnp.float32, -bound1, bound1)
    w2 = jax.random.uniform(k3, (HIDDEN_SIZE, ACTION_DIM), jnp.float32, -bound2, bound2)
    b2 = jax.random.uniform(k4, (ACTION_DIM,), jnp.float32, -bound2, bound2)
    return w1, b1, w2, b2


if __name__ == "__main__":
    key = jax.random.PRNGKey(0)
    pkey, xkey1, xkey2 = jax.random.split(key, 3)
    w1, b1, w2, b2 = init_params(pkey)
    params = prepare_params(w1, b1, w2, b2)   # pad/cast once, not per call

    def ref_fn(x):
        return jnp.maximum(x @ w1 + b1[None, :], 0.0) @ w2 + b2[None, :]

    # Small single-tile batch (B=8 -> bucket 16, grid=(1,)).
    x_small = jax.random.normal(xkey1, (8, STATE_DIM), jnp.float32)
    out_small = jax.block_until_ready(dqn_forward(x_small, params))
    assert out_small.shape == (8, ACTION_DIM)
    assert jnp.allclose(out_small, ref_fn(x_small), atol=5e-2, rtol=5e-2), \
        float(jnp.max(jnp.abs(out_small - ref_fn(x_small))))

    # Multi-tile batch (B=40 -> bucket 64, tb=32, grid=(2,)) exercises tiling/bucketing.
    x_big = jax.random.normal(xkey2, (40, STATE_DIM), jnp.float32)
    out_big = jax.block_until_ready(dqn_forward(x_big, params))
    assert out_big.shape == (40, ACTION_DIM)
    assert jnp.allclose(out_big, ref_fn(x_big), atol=5e-2, rtol=5e-2), \
        float(jnp.max(jnp.abs(out_big - ref_fn(x_big))))

    print("KERNEL_OK")
</pallas_src>

<mosaic_0001>
module attributes {stable_mosaic.version = 11 : i64} {
  func.func @dqn_kernel(%arg0: i32, %arg1: memref<16x8xbf16, #tpu.memory_space<vmem>>, %arg2: memref<8x128xbf16, #tpu.memory_space<vmem>>, %arg3: memref<1x128xf32, #tpu.memory_space<vmem>>, %arg4: memref<128x128xbf16, #tpu.memory_space<vmem>>, %arg5: memref<1x128xf32, #tpu.memory_space<vmem>>, %arg6: memref<16x128xbf16, #tpu.memory_space<vmem>>) attributes {dimension_semantics = [#tpu.dimension_semantics<parallel>], iteration_bounds = array<i64: 1>, scalar_prefetch = 0 : i64, scratch_operands = 0 : i64, tpu.core_type = #tpu.core_type<tc>, window_params = [{transform_indices = @transform_0, window_bounds = array<i64: 16, 8>}, {pipeline_mode = #tpu.pipeline_mode<synchronous>, transform_indices = @transform_1, window_bounds = array<i64: 8, 128>}, {pipeline_mode = #tpu.pipeline_mode<synchronous>, transform_indices = @transform_2, window_bounds = array<i64: 1, 128>}, {pipeline_mode = #tpu.pipeline_mode<synchronous>, transform_indices = @transform_3, window_bounds = array<i64: 128, 128>}, {pipeline_mode = #tpu.pipeline_mode<synchronous>, transform_indices = @transform_4, window_bounds = array<i64: 1, 128>}, {transform_indices = @transform_5, window_bounds = array<i64: 16, 128>}]} {
    %c0 = arith.constant 0 : index
    %c0_0 = arith.constant 0 : index
    %0 = vector.load %arg1[%c0, %c0_0] : memref<16x8xbf16, #tpu.memory_space<vmem>>, vector<16x8xbf16>
    %c0_1 = arith.constant 0 : index
    %c0_2 = arith.constant 0 : index
    %1 = vector.load %arg2[%c0_1, %c0_2] : memref<8x128xbf16, #tpu.memory_space<vmem>>, vector<8x128xbf16>
    %cst = arith.constant dense<0.000000e+00> : vector<16x128xf32>
    %2 = tpu.matmul %0, %1, %cst {dimension_numbers = #tpu.dot_dimension_numbers<[1], [0], [0], [1], [0, 0, 1, 1], [], []>} : vector<16x8xbf16>, vector<8x128xbf16>, vector<16x128xf32> -> vector<16x128xf32>
    %c0_3 = arith.constant 0 : index
    %c0_4 = arith.constant 0 : index
    %3 = vector.load %arg3[%c0_3, %c0_4] : memref<1x128xf32, #tpu.memory_space<vmem>>, vector<1x128xf32>
    %4 = vector.broadcast %3 : vector<1x128xf32> to vector<16x128xf32>
    %5 = arith.addf %2, %4 : vector<16x128xf32>
    %cst_5 = arith.constant 0.000000e+00 : f32
    %6 = vector.broadcast %cst_5 : f32 to vector<16x128xf32>
    %7 = arith.maximumf %5, %6 : vector<16x128xf32>
    %8 = arith.truncf %7 : vector<16x128xf32> to vector<16x128xbf16>
    %c0_6 = arith.constant 0 : index
    %c0_7 = arith.constant 0 : index
    %9 = vector.load %arg4[%c0_6, %c0_7] : memref<128x128xbf16, #tpu.memory_space<vmem>>, vector<128x128xbf16>
    %cst_8 = arith.constant dense<0.000000e+00> : vector<16x128xf32>
    %10 = tpu.matmul %8, %9, %cst_8 {dimension_numbers = #tpu.dot_dimension_numbers<[1], [0], [0], [1], [0, 0, 1, 1], [], []>} : vector<16x128xbf16>, vector<128x128xbf16>, vector<16x128xf32> -> vector<16x128xf32>
    %c0_9 = arith.constant 0 : index
    %c0_10 = arith.constant 0 : index
    %11 = vector.load %arg5[%c0_9, %c0_10] : memref<1x128xf32, #tpu.memory_space<vmem>>, vector<1x128xf32>
    %12 = vector.broadcast %11 : vector<1x128xf32> to vector<16x128xf32>
    %13 = arith.addf %10, %12 : vector<16x128xf32>
    %14 = arith.truncf %13 : vector<16x128xf32> to vector<16x128xbf16>
    %c0_11 = arith.constant 0 : index
    %c0_12 = arith.constant 0 : index
    %15 = vector.load %arg6[%c0_11, %c0_12] : memref<16x128xbf16, #tpu.memory_space<vmem>>, vector<16x128xbf16>
    tpu.vector_store %arg6[%c0_11, %c0_12], %14 {strides = array<i32>} : memref<16x128xbf16, #tpu.memory_space<vmem>>, vector<16x128xbf16>,
    return
  }
  func.func @transform_0(%arg0: i32) -> (i32, i32) {
    %c0_i32 = arith.constant 0 : i32
    %c0_i32_0 = arith.constant 0 : i32
    return %arg0, %c0_i32 : i32, i32
  }
  func.func @transform_1(%arg0: i32) -> (i32, i32) {
    %c0_i32 = arith.constant 0 : i32
    %c0_i32_0 = arith.constant 0 : i32
    %c0_i32_1 = arith.constant 0 : i32
    return %c0_i32, %c0_i32_0 : i32, i32
  }
  func.func @transform_2(%arg0: i32) -> (i32, i32) {
    %c0_i32 = arith.constant 0 : i32
    %c0_i32_0 = arith.constant 0 : i32
    %c0_i32_1 = arith.constant 0 : i32
    return %c0_i32, %c0_i32_0 : i32, i32
  }
  func.func @transform_3(%arg0: i32) -> (i32, i32) {
    %c0_i32 = arith.constant 0 : i32
    %c0_i32_0 = arith.constant 0 : i32
    %c0_i32_1 = arith.constant 0 : i32
    return %c0_i32, %c0_i32_0 : i32, i32
  }
  func.func @transform_4(%arg0: i32) -> (i32, i32) {
    %c0_i32 = arith.constant 0 : i32
    %c0_i32_0 = arith.constant 0 : i32
    %c0_i32_1 = arith.constant 0 : i32
    return %c0_i32, %c0_i32_0 : i32, i32
  }
  func.func @transform_5(%arg0: i32) -> (i32, i32) {
    %c0_i32 = arith.constant 0 : i32
    %c0_i32_0 = arith.constant 0 : i32
    return %arg0, %c0_i32 : i32, i32
  }
}

</mosaic_0001>

<bundles_post_ra>
// kernel: _dqn_forward_padded.1
= control target key start
LH: loop header
LB: loop body
LE: loop exit
PB: predicated region body
PF: predicated region fallthrough
CT: control target
= control target key end

     0   :  { %10 = vsyncpa [#allocation3], 0  ;;  %s325_s18 = smov [#allocation2]   ;;  %s387_s0 = inlined_call_operand.vmem [shape: bf16[16,8], index: 0, kind: input, shape index: {}]   ;;  %s388_s1 = inlined_call_operand.vmem [shape: bf16[8,128], index: 1, kind: input, shape index: {}]   ;;  %s389_s2 = inlined_call_operand.vmem [shape: f32[1,128], index: 2, kind: input, shape index: {}]   ;;  %s390_s3 = inlined_call_operand.hbm [shape: bf16[128,128], index: 3, kind: input, shape index: {}]   ;;  %s391_s4 = inlined_call_operand.vmem [shape: f32[1,128], index: 4, kind: input, shape index: {}]   ;;  %s392_s5 = inlined_call_operand.vmem [shape: bf16[16,128], index: 5, kind: output, shape index: {}]  }
   0x1   :  { %s22_s19 = sshll.u32 %s325_s18, 4  ;;  %s301_s22 = scalar_lea.hbm %s390_s3, 1024  ;;  %s23_s19 = int_to_ptr.vmem [resolvable:$true] %s22_s19 }
   0x2   :  { %p302_p0 = scmp.ne.s32.totalorder %s390_s3, %s301_s22  ;;  %p305_p1 = scmp.lt.u32.totalorder %s301_s22, %s390_s3 }
   0x4   :  { %p307_p2 = pnand %p305_p1, %p302_p0 }
   0x6   :  { %310 = shalt.err (!%p307_p2)
}
   0x7   :  { %s311_s27 = scalar_lea.vmem %s23_s19, 1024  ;;  %p316_p4 = scmp.lt.s32.totalorder %s23_s19, %s23_s19 }
   0x8   :  { %p312_p3 = scmp.ne.s32.totalorder %s23_s19, %s311_s27  ;;  %p317_p5 = scmp.lt.s32.totalorder %s311_s27, %s311_s27 }
   0xa   :  { %p318_p6 = por %p317_p5, %p316_p4 }
   0xc   :  { %p319_p7 = pnand %p318_p6, %p312_p3 }
   0xe   :  { %322 = shalt.err (!%p319_p7)
}
   0xf   :  { %s326_s28 = smov 64   ;;  %s327_s29 = smov 4  }
  0x10   :  { %28 = dma.hbm_to_vmem [thread:$0]  %s390_s3, 1024, %s23_s19, [#allocation3], %s326_s28, %s326_s28, %s327_s29  }
  0x11   :  { %323 = dma.done.wait [#allocation3], 1024  }
  0x12   :  { %324 = vsyncadd [#allocation3], 4294966272  ;;  %v328_v0 = vmov 0.0   ;;  %vm329_vm0 = vmmov 0   ;;  %vm54_vm1 = vcmask 1043456   ;;  %v292_v3 = vld [vmem:[%s387_s0] sm:$0xff]  }
  0x13   :  { %261 = vmatprep.subr.bf16.mxu0 %v328_v0  ;;  %263 = vmatprep.mubr.msk.bf16.mxu0 %vm329_vm0, %v328_v0  ;;  %v37_v1 = vld [vmem:[%s388_s1] sm:$0xf]  ;;  %vm50_vm2 = vcmask 64512   ;;  %v294_v5 = vld [vmem:[#allocation2 + $0x8] sm:$0xff]   ;;  %v295_v6 = vld [vmem:[#allocation2 + $0x10] sm:$0xff]  }
  0x14   :  { %267 = vmatprep.subr.bf16.mxu1 %v328_v0  ;;  %283 = vmatprep.mubr.msk.bf16.mxu1 %vm329_vm0, %v328_v0  ;;  %v56_v2 = vsel %vm54_vm1, %v37_v1, 0  ;;  %v293_v4 = vld [vmem:[#allocation2] sm:$0xff]   ;;  %v296_v7 = vld [vmem:[#allocation2 + $0x18] sm:$0xff]   ;;  %v298_v9 = vld [vmem:[#allocation2 + $0x28] sm:$0xff]  }
  0x15   :  { %262 = vmatpush3.bf16.msra.mxu0 %v56_v2  ;;  %268 = vmatpush3.bf16.msra.mxu1 %v293_v4  ;;  %v297_v8 = vld [vmem:[#allocation2 + $0x20] sm:$0xff]   ;;  %v299_v10 = vld [vmem:[#allocation2 + $0x30] sm:$0xff]   ;;  %v300_v11 = vld [vmem:[#allocation2 + $0x38] sm:$0xff]  }
  0x16   :  { %269 = vmatprep.subr.bf16.mxu1 %v328_v0  ;;  %v229_v12 = vld [vmem:[%s389_s2] ss:$0 sm:$0xff] }
  0x17   :  { %v232_v22 = vld [vmem:[%s391_s4] ss:$0 sm:$0xff] }
  0x18   :  { %264 = vmatmul.mubr.msk.bf16.vlgmr.msra.gmra.mrb[0].mxu0 %vm50_vm2, %v292_v3 }
  0x19   :  { %270 = vmatpush3.bf16.msra.mxu1 %v294_v5 }
  0x1a   :  { %271 = vmatprep.subr.bf16.mxu1 %v328_v0 }
  0x1d   :  { %272 = vmatpush3.bf16.msra.mxu1 %v295_v6 }
  0x1e   :  { %273 = vmatprep.subr.bf16.mxu1 %v328_v0 }
  0x21   :  { %274 = vmatpush3.bf16.msra.mxu1 %v296_v7 }
  0x22   :  { %275 = vmatprep.subr.bf16.mxu1 %v328_v0 }
  0x25   :  { %276 = vmatpush3.bf16.msra.mxu1 %v297_v8 }
  0x26   :  { %277 = vmatprep.subr.bf16.mxu1 %v328_v0 }
  0x29   :  { %278 = vmatpush3.bf16.msra.mxu1 %v298_v9 }
  0x2a   :  { %279 = vmatprep.subr.bf16.mxu1 %v328_v0 }
  0x2d   :  { %280 = vmatpush3.bf16.msra.mxu1 %v299_v10 }
  0x2e   :  { %281 = vmatprep.subr.bf16.mxu1 %v328_v0 }
  0x31   :  { %282 = vmatpush3.bf16.msra.mxu1 %v300_v11 }
  0xeb   :  { %v92_v13 = vpop.f32.mrb[0].mxu0 }
  0xec   :  { %v93_v14 = vadd.f32 %v229_v12, %v92_v13  ;;  %v265_v15 = vpop.f32.mrb[1].mxu0 }
  0xed   :  { %v95_v16 = vpop.f32.mrb[2].mxu0 }
  0xee   :  { %v96_v17 = vadd.f32 %v229_v12, %v95_v16  ;;  %v266_v18 = vpop.f32.mrb[3].mxu0  ;;  %v99_v19 = vmax.f32 %v93_v14, 0.0 }
  0xf0   :  { %v100_v20 = vmax.f32 %v96_v17, 0.0 }
  0xf2   :  { %v101_v21 = vpack.c.bf16 %v100_v20, %v99_v19 }
  0xf4   :  { %284 = vmatmul.mubr.bf16.vlgmr.msra.gmra.mrb[0].mxu1 %v101_v21 }
 0x1c7   :  { %v207_v23 = vpop.f32.mrb[0].mxu1 }
 0x1c8   :  { %v285_v24 = vpop.f32.mrb[1].mxu1  ;;  %v208_v26 = vadd.f32 %v232_v22, %v207_v23 }
 0x1c9   :  { %v210_v25 = vpop.f32.mrb[2].mxu1 }
 0x1ca   :  { %v211_v27 = vadd.f32 %v232_v22, %v210_v25  ;;  %v286_v28 = vpop.f32.mrb[3].mxu1 }
 0x1cc   :  { %v248_v29 = vpack.c.bf16 %v211_v27, %v208_v26 }
 0x1ce   :  { %249 = vst [vmem:[%s392_s5] sm:$0xff] %v248_v29  }
 0x1cf   :  { %228 = vsyncpa [#allocation3], 1 }

</bundles_post_ra>
